<compile_context>
chip_gen: v7x
topology: tpu7x:2x2x1
jax: 0.10.0
libtpu: 0.0.40
codegen_flags: <defaults>
</compile_context>

<pallas_src>
import jax
import jax.numpy as jnp
import numpy as np
from jax.experimental import pallas as pl
from jax.experimental.pallas import tpu as pltpu

# ---- Model hyper-parameters (consistent with the PyTorch module) -------------
#   input_size = (in_chans=4, input_time_length=32), sampling_rate = 50
IN_CHANS = 4
T_IN = 32
SAMPLING_RATE = 50
N_CLASSES = 1
NF = 40                                        # n_filters_conv
FT = round(25 * SAMPLING_RATE / 250)           # filter_time_length = 5
PT = round(75 * SAMPLING_RATE / 250)           # pool_time_length   = 15
PS = round(15 * SAMPLING_RATE / 250)           # pool_time_stride   = 3
PAD = FT // 2                                  # temporal conv padding = 2
T_CONV = T_IN + 2 * PAD - FT + 1               # = 32 ("same" conv, odd kernel)
FCL = (T_IN - PT) // PS + 1                    # final_conv_length = 6
BN_EPS = 1e-5
LANE = 128
assert LANE % T_CONV == 0
B_GROUP = LANE // T_CONV                       # batch columns per 128-lane tile


def _elu(x):
    # ELU(alpha=1); clamp exp argument so the discarded branch stays finite.
    return jnp.where(x > 0, x, jnp.exp(jnp.minimum(x, 0.0)) - 1.0)


# ---- Pallas kernel -----------------------------------------------------------
def shallow_fbcsp_kernel(x_ref, w1_ref, w2_ref, wf_ref, out_ref):
    # Temporal conv + BN1 in ONE matmul: (C*NF+1, C*FT+1) @ (C*FT+1, b_pad*T).
    # The last row/col of the augmented weight carry the BN1 shift via the
    # constant-one row of xcol, and produce a constant-one row in a1.
    a1 = _elu(jnp.dot(w1_ref[...], x_ref[...],
                      preferred_element_type=jnp.float32))       # (161, 128)

    # Spatial conv + BN2 in ONE matmul: (NF+1, C*NF+1) @ (C*NF+1, b_pad*T).
    # a1's constant-one row carries the BN2 shift; a2's last row is exactly 1
    # and carries the classifier bias through the pooling stage.
    a2 = _elu(jnp.dot(w2_ref[...], a1,
                      preferred_element_type=jnp.float32))       # (41, 128)

    # Dropout: identity at inference time.
    # Fused AvgPool + Linear: VPU multiply by the precomputed weight, sublane
    # reduce over filters (XLU), then a per-batch lane-block reduce.  No
    # selector matmul, no extra DMA'd operand.
    p = a2 * wf_ref[...]                                         # (41, 128)
    q = jnp.sum(p, axis=0, keepdims=True)                        # (1, 128)
    nb = q.shape[1] // T_CONV                                    # static
    logits = jnp.concatenate(
        [jnp.sum(q[:, i * T_CONV:(i + 1) * T_CONV], axis=1, keepdims=True)
         for i in range(nb)], axis=1)                            # (1, b_pad)
    out_ref[...] = jax.nn.sigmoid(logits)                        # lane-dense


# ---- One-time (model-load) parameter preprocessing ----------------------------
def prepare_constants(params, b_pad):
    """Fold BN / biases / pooling / classifier into 3 constant kernel operands.

    Runs ONCE at model-load time (host-side numpy); nothing here is on the
    per-call path.
    """
    w1, bn1, w2, bn2, wlin, blin = jax.tree_util.tree_map(np.asarray, params)
    g1, be1, m1, v1 = bn1
    s1 = g1 / np.sqrt(v1 + BN_EPS)
    sh1 = be1 - m1 * s1
    g2, be2, m2, v2 = bn2
    s2 = g2 / np.sqrt(v2 + BN_EPS)
    sh2 = be2 - m2 * s2

    # Augmented temporal-conv weight: block-diagonal over channels, BN1 scale
    # folded into the rows, BN1 shift in the last column (multiplies xcol's
    # constant-one row), last row passes that one through to a1.
    w1s = s1[:, None] * w1                                        # (NF, FT)
    w1aug = np.zeros((IN_CHANS * NF + 1, IN_CHANS * FT + 1), np.float32)
    w1aug[:IN_CHANS * NF, :IN_CHANS * FT] = np.kron(
        np.eye(IN_CHANS, dtype=np.float32), w1s)                  # (160, 20)
    w1aug[:IN_CHANS * NF, -1] = np.tile(sh1, IN_CHANS)
    w1aug[-1, -1] = 1.0

    # Augmented spatial-conv weight: w2flat[f, c*NF+g] = w2[f, g, c], BN2 scale
    # folded in, BN2 shift in the last column, last row keeps the constant one.
    w2flat = np.transpose(w2, (0, 2, 1)).reshape(NF, IN_CHANS * NF)
    w2aug = np.zeros((NF + 1, IN_CHANS * NF + 1), np.float32)
    w2aug[:NF, :IN_CHANS * NF] = s2[:, None] * w2flat
    w2aug[:NF, -1] = sh2
    w2aug[-1, -1] = 1.0

    # AvgPool + Linear fused: wfused[f, t] = sum_p pmat[t, p] * wlin2[f, p];
    # tiled over batch lane-blocks; last row carries blin (paired with the
    # constant-one row of a2: sum over T_CONV lanes * blin/T_CONV = blin).
    pmat = np.zeros((T_CONV, FCL), np.float32)
    for p in range(FCL):
        pmat[p * PS:p * PS + PT, p] = 1.0 / PT
    wfused = wlin.reshape(NF, FCL) @ pmat.T                       # (NF, T_CONV)
    wf = np.zeros((NF + 1, b_pad * T_CONV), np.float32)
    wf[:NF] = np.tile(wfused, (1, b_pad))
    wf[NF] = float(blin[0]) / T_CONV

    return (jnp.asarray(w1aug), jnp.asarray(w2aug), jnp.asarray(wf))


# ---- Per-call forward ----------------------------------------------------------
def _full_spec(shape):
    nd = len(shape)
    return pl.BlockSpec(shape, lambda i, _nd=nd: (0,) * _nd)


def shallow_fbcsp_forward(x, w1aug, w2aug, wf):
    """x: (B, 1, in_chans, T) float32 -> (B,) sigmoid outputs (inference)."""
    bsz = x.shape[0]
    b_pad = wf.shape[1] // T_CONV
    assert b_pad * T_CONV == wf.shape[1] and bsz <= b_pad

    # Per-call device work: only the im2col of x (pad + 5 slices + transpose),
    # one small XLA fusion under jit.  An in-kernel im2col would need ~20
    # strided sub-vreg copies for no win at this size, so it stays here.
    xp = jnp.pad(x[:, 0].astype(jnp.float32),
                 ((0, b_pad - bsz), (0, 0), (PAD, PAD)))          # (b_pad, C, T+2p)
    cols = jnp.stack([xp[:, :, k:k + T_CONV] for k in range(FT)],
                     axis=2)                                      # (b_pad, C, FT, T)
    xcol = jnp.transpose(cols, (1, 2, 0, 3)).reshape(
        IN_CHANS * FT, b_pad * T_CONV)                            # (C*FT, b_pad*T)
    xcol_aug = jnp.concatenate(
        [xcol, jnp.ones((1, b_pad * T_CONV), jnp.float32)], axis=0)  # (21, 128)

    inputs = (xcol_aug, w1aug, w2aug, wf)
    out = pl.pallas_call(
        shallow_fbcsp_kernel,
        out_shape=jax.ShapeDtypeStruct((1, b_pad), jnp.float32),
        grid=(1,),
        in_specs=[_full_spec(a.shape) for a in inputs],
        out_specs=_full_spec((1, b_pad)),
        compiler_params=pltpu.CompilerParams(
            dimension_semantics=("arbitrary",)),
        cost_estimate=pl.CostEstimate(flops=2_600_000,
                                      transcendentals=26_000,
                                      bytes_accessed=72_000),
    )(*inputs)
    # Mirrors torch.squeeze (returns a scalar when B == 1).
    return jnp.squeeze(out[0, :bsz])


# ---- Pure-JAX reference (mirrors the PyTorch forward, eval mode) ---------------
def _fold_bn(bn):
    gamma, beta, mean, var = bn
    scale = gamma / jnp.sqrt(var + BN_EPS)
    shift = beta - mean * scale
    return scale, shift


def reference_forward(x, params):
    (w1, bn1, w2, bn2, wlin, blin) = params
    s1, sh1 = _fold_bn(bn1)
    s2, sh2 = _fold_bn(bn2)
    bsz = x.shape[0]
    xpad = jnp.pad(x[:, 0], ((0, 0), (0, 0), (PAD, PAD)))
    stacked = jnp.stack([xpad[:, :, k:k + T_CONV] for k in range(FT)], axis=-1)
    z1 = jnp.einsum('bctk,fk->bfct', stacked, w1)
    z1 = _elu(s1[None, :, None, None] * z1 + sh1[None, :, None, None])
    z2 = jnp.einsum('fgc,bgct->bft', w2, z1)
    z2 = _elu(s2[None, :, None] * z2 + sh2[None, :, None])
    pooled = jnp.stack(
        [z2[:, :, p * PS:p * PS + PT].mean(-1) for p in range(FCL)], axis=-1)
    flat = pooled.reshape(bsz, NF * FCL)
    logit = flat @ wlin.T + blin[None, :]
    return jnp.squeeze(jax.nn.sigmoid(logit))


# ---- Deterministic parameter construction --------------------------------------
def make_params(key):
    ks = jax.random.split(key, 12)
    w1 = 0.2 * jax.random.normal(ks[0], (NF, FT), jnp.float32)
    bn1 = (1.0 + 0.1 * jax.random.normal(ks[1], (NF,), jnp.float32),
           0.1 * jax.random.normal(ks[2], (NF,), jnp.float32),
           0.05 * jax.random.normal(ks[3], (NF,), jnp.float32),
           jax.random.uniform(ks[4], (NF,), jnp.float32, minval=0.5, maxval=1.5))
    w2 = 0.1 * jax.random.normal(ks[5], (NF, NF, IN_CHANS), jnp.float32)
    bn2 = (1.0 + 0.1 * jax.random.normal(ks[6], (NF,), jnp.float32),
           0.1 * jax.random.normal(ks[7], (NF,), jnp.float32),
           0.05 * jax.random.normal(ks[8], (NF,), jnp.float32),
           jax.random.uniform(ks[9], (NF,), jnp.float32, minval=0.5, maxval=1.5))
    wlin = 0.05 * jax.random.normal(ks[10], (N_CLASSES, NF * FCL * N_CLASSES),
                                    jnp.float32)
    blin = 0.1 * jax.random.normal(ks[11], (N_CLASSES,), jnp.float32)
    return (w1, bn1, w2, bn2, wlin, blin)


if __name__ == "__main__":
    key = jax.random.PRNGKey(0)
    kx, kp = jax.random.split(key)
    batch = 4                                   # batch*T_CONV = 128 -> lane-dense
    x = jax.random.normal(kx, (batch, 1, IN_CHANS, T_IN), jnp.float32)
    params = make_params(kp)

    # One-time (model-load) weight preprocessing -- OFF the per-call path.
    b_pad = ((batch + B_GROUP - 1) // B_GROUP) * B_GROUP
    consts = prepare_constants(params, b_pad)

    fwd = jax.jit(shallow_fbcsp_forward)
    out = jax.block_until_ready(fwd(x, *consts))

    ref = jax.block_until_ready(reference_forward(x, params))
    assert out.shape == (batch,)
    np.testing.assert_allclose(np.asarray(out), np.asarray(ref),
                               atol=2e-3, rtol=2e-3)
    print("KERNEL_OK")
</pallas_src>

<mosaic_0001>
module attributes {stable_mosaic.version = 11 : i64} {
  func.func @shallow_fbcsp_kernel(%arg0: i32, %arg1: memref<21x128xf32, #tpu.memory_space<vmem>>, %arg2: memref<161x21xf32, #tpu.memory_space<vmem>>, %arg3: memref<41x161xf32, #tpu.memory_space<vmem>>, %arg4: memref<41x128xf32, #tpu.memory_space<vmem>>, %arg5: memref<1x4xf32, #tpu.memory_space<vmem>>) attributes {dimension_semantics = [#tpu.dimension_semantics<arbitrary>], iteration_bounds = array<i64: 1>, scalar_prefetch = 0 : i64, scratch_operands = 0 : i64, tpu.core_type = #tpu.core_type<tc>, window_params = [{pipeline_mode = #tpu.pipeline_mode<synchronous>, transform_indices = @transform_0, window_bounds = array<i64: 21, 128>}, {pipeline_mode = #tpu.pipeline_mode<synchronous>, transform_indices = @transform_1, window_bounds = array<i64: 161, 21>}, {pipeline_mode = #tpu.pipeline_mode<synchronous>, transform_indices = @transform_2, window_bounds = array<i64: 41, 161>}, {pipeline_mode = #tpu.pipeline_mode<synchronous>, transform_indices = @transform_3, window_bounds = array<i64: 41, 128>}, {pipeline_mode = #tpu.pipeline_mode<synchronous>, transform_indices = @transform_4, window_bounds = array<i64: 1, 4>}]} {
    %c0 = arith.constant 0 : index
    %c0_0 = arith.constant 0 : index
    %0 = vector.load %arg2[%c0, %c0_0] : memref<161x21xf32, #tpu.memory_space<vmem>>, vector<161x21xf32>
    %c0_1 = arith.constant 0 : index
    %c0_2 = arith.constant 0 : index
    %1 = vector.load %arg1[%c0_1, %c0_2] : memref<21x128xf32, #tpu.memory_space<vmem>>, vector<21x128xf32>
    %cst = arith.constant dense<0.000000e+00> : vector<161x128xf32>
    %2 = tpu.matmul %0, %1, %cst {dimension_numbers = #tpu.dot_dimension_numbers<[1], [0], [0], [1], [0, 0, 1, 1], [], []>} : vector<161x21xf32>, vector<21x128xf32>, vector<161x128xf32> -> vector<161x128xf32>
    %cst_3 = arith.constant 0.000000e+00 : f32
    %3 = vector.broadcast %cst_3 : f32 to vector<161x128xf32>
    %4 = arith.cmpf ogt, %2, %3 : vector<161x128xf32>
    %cst_4 = arith.constant 0.000000e+00 : f32
    %5 = vector.broadcast %cst_4 : f32 to vector<161x128xf32>
    %6 = arith.minimumf %2, %5 : vector<161x128xf32>
    %7 = math.exp %6 : vector<161x128xf32>
    %cst_5 = arith.constant 1.000000e+00 : f32
    %8 = vector.broadcast %cst_5 : f32 to vector<161x128xf32>
    %9 = arith.subf %7, %8 : vector<161x128xf32>
    %10 = arith.select %4, %2, %9 : vector<161x128xi1>, vector<161x128xf32>
    %c0_6 = arith.constant 0 : index
    %c0_7 = arith.constant 0 : index
    %11 = vector.load %arg3[%c0_6, %c0_7] : memref<41x161xf32, #tpu.memory_space<vmem>>, vector<41x161xf32>
    %cst_8 = arith.constant dense<0.000000e+00> : vector<41x128xf32>
    %12 = tpu.matmul %11, %10, %cst_8 {dimension_numbers = #tpu.dot_dimension_numbers<[1], [0], [0], [1], [0, 0, 1, 1], [], []>} : vector<41x161xf32>, vector<161x128xf32>, vector<41x128xf32> -> vector<41x128xf32>
    %cst_9 = arith.constant 0.000000e+00 : f32
    %13 = vector.broadcast %cst_9 : f32 to vector<41x128xf32>
    %14 = arith.cmpf ogt, %12, %13 : vector<41x128xf32>
    %cst_10 = arith.constant 0.000000e+00 : f32
    %15 = vector.broadcast %cst_10 : f32 to vector<41x128xf32>
    %16 = arith.minimumf %12, %15 : vector<41x128xf32>
    %17 = math.exp %16 : vector<41x128xf32>
    %cst_11 = arith.constant 1.000000e+00 : f32
    %18 = vector.broadcast %cst_11 : f32 to vector<41x128xf32>
    %19 = arith.subf %17, %18 : vector<41x128xf32>
    %20 = arith.select %14, %12, %19 : vector<41x128xi1>, vector<41x128xf32>
    %c0_12 = arith.constant 0 : index
    %c0_13 = arith.constant 0 : index
    %21 = vector.load %arg4[%c0_12, %c0_13] : memref<41x128xf32, #tpu.memory_space<vmem>>, vector<41x128xf32>
    %22 = arith.mulf %20, %21 : vector<41x128xf32>
    %cst_14 = arith.constant dense<0.000000e+00> : vector<128xf32>
    %23 = vector.multi_reduction <add>, %22, %cst_14 [0] : vector<41x128xf32> to vector<128xf32>
    %24 = vector.shape_cast %23 : vector<128xf32> to vector<1x128xf32>
    %25 = vector.extract_strided_slice %24 {offsets = [0, 0], sizes = [1, 32], strides = [1, 1]} : vector<1x128xf32> to vector<1x32xf32>
    %cst_15 = arith.constant dense<0.000000e+00> : vector<1xf32>
    %26 = vector.multi_reduction <add>, %25, %cst_15 [1] : vector<1x32xf32> to vector<1xf32>
    %27 = vector.shape_cast %26 : vector<1xf32> to vector<1x1xf32>
    %28 = vector.extract_strided_slice %24 {offsets = [0, 32], sizes = [1, 32], strides = [1, 1]} : vector<1x128xf32> to vector<1x32xf32>
    %cst_16 = arith.constant dense<0.000000e+00> : vector<1xf32>
    %29 = vector.multi_reduction <add>, %28, %cst_16 [1] : vector<1x32xf32> to vector<1xf32>
    %30 = vector.shape_cast %29 : vector<1xf32> to vector<1x1xf32>
    %31 = vector.extract_strided_slice %24 {offsets = [0, 64], sizes = [1, 32], strides = [1, 1]} : vector<1x128xf32> to vector<1x32xf32>
    %cst_17 = arith.constant dense<0.000000e+00> : vector<1xf32>
    %32 = vector.multi_reduction <add>, %31, %cst_17 [1] : vector<1x32xf32> to vector<1xf32>
    %33 = vector.shape_cast %32 : vector<1xf32> to vector<1x1xf32>
    %34 = vector.extract_strided_slice %24 {offsets = [0, 96], sizes = [1, 32], strides = [1, 1]} : vector<1x128xf32> to vector<1x32xf32>
    %cst_18 = arith.constant dense<0.000000e+00> : vector<1xf32>
    %35 = vector.multi_reduction <add>, %34, %cst_18 [1] : vector<1x32xf32> to vector<1xf32>
    %36 = vector.shape_cast %35 : vector<1xf32> to vector<1x1xf32>
    %37 = tpu.concatenate %27, %30, %33, %36 in 1 : vector<1x1xf32>, vector<1x1xf32>, vector<1x1xf32>, vector<1x1xf32> -> vector<1x4xf32>
    %38 = arith.negf %37 : vector<1x4xf32>
    %39 = math.exp %38 : vector<1x4xf32>
    %cst_19 = arith.constant 1.000000e+00 : f32
    %40 = vector.broadcast %cst_19 : f32 to vector<1x4xf32>
    %41 = arith.addf %40, %39 : vector<1x4xf32>
    %42 = arith.divf %40, %41 : vector<1x4xf32>
    %c0_20 = arith.constant 0 : index
    %c0_21 = arith.constant 0 : index
    %43 = vector.load %arg5[%c0_20, %c0_21] : memref<1x4xf32, #tpu.memory_space<vmem>>, vector<1x4xf32>
    tpu.vector_store %arg5[%c0_20, %c0_21], %42 {strides = array<i32>} : memref<1x4xf32, #tpu.memory_space<vmem>>, vector<1x4xf32>,
    return
  }
  func.func @transform_0(%arg0: i32) -> (i32, i32) {
    %c0_i32 = arith.constant 0 : i32
    %c0_i32_0 = arith.constant 0 : i32
    %c0_i32_1 = arith.constant 0 : i32
    return %c0_i32, %c0_i32_0 : i32, i32
  }
  func.func @transform_1(%arg0: i32) -> (i32, i32) {
    %c0_i32 = arith.constant 0 : i32
    %c0_i32_0 = arith.constant 0 : i32
    %c0_i32_1 = arith.constant 0 : i32
    return %c0_i32, %c0_i32_0 : i32, i32
  }
  func.func @transform_2(%arg0: i32) -> (i32, i32) {
    %c0_i32 = arith.constant 0 : i32
    %c0_i32_0 = arith.constant 0 : i32
    %c0_i32_1 = arith.constant 0 : i32
    return %c0_i32, %c0_i32_0 : i32, i32
  }
  func.func @transform_3(%arg0: i32) -> (i32, i32) {
    %c0_i32 = arith.constant 0 : i32
    %c0_i32_0 = arith.constant 0 : i32
    %c0_i32_1 = arith.constant 0 : i32
    return %c0_i32, %c0_i32_0 : i32, i32
  }
  func.func @transform_4(%arg0: i32) -> (i32, i32) {
    %c0_i32 = arith.constant 0 : i32
    %c0_i32_0 = arith.constant 0 : i32
    %c0_i32_1 = arith.constant 0 : i32
    return %c0_i32, %c0_i32_0 : i32, i32
  }
}

</mosaic_0001>

<bundles_post_ra>
// kernel: shallow_fbcsp_forward.1
= control target key start
LH: loop header
LB: loop body
LE: loop exit
PB: predicated region body
PF: predicated region fallthrough
CT: control target
= control target key end

     0   :  { %v919_v2 = vmov 0.0|0.0   ;;  %vm920_vm0 = vmmov 0   ;;  %v921_v4 = vmov 0.0   ;;  %vm106_vm1 = vcmask 1044480   ;;  %s1173_s0 = inlined_call_operand.vmem [shape: f32[21,128], index: 0, kind: input, shape index: {}]   ;;  %s1174_s1 = inlined_call_operand.vmem [shape: f32[161,21], index: 1, kind: input, shape index: {}]   ;;  %s1175_s2 = inlined_call_operand.vmem [shape: f32[41,161], index: 2, kind: input, shape index: {}]   ;;  %s1176_s3 = inlined_call_operand.vmem [shape: f32[41,128], index: 3, kind: input, shape index: {}]   ;;  %s1177_s4 = inlined_call_operand.hbm [shape: f32[1,4], index: 4, kind: output, shape index: {}]  }
   0x1   :  { %v39_v0 = vld [vmem:[%s1173_s0] sm:$0xff]  ;;  %v40_v1 = vld [vmem:[%s1173_s0 + $0x8] sm:$0xff]  ;;  %797 = vmatprep.subr.bf16.mxu0 %v919_v2  ;;  %800 = vmatprep.subr.bf16.mxu1 %v919_v2  ;;  %v41_v5 = vld [vmem:[%s1173_s0 + $0x10] sm:$0x1f]  ;;  %vm42_vm2 = vcmask 171008  }
   0x2   :  { %v798_v3 = vpack.c.bf16 %v40_v1, %v39_v0  ;;  %734 = vmatprep.mubr.msk.f32.mxu0 %vm920_vm0, %v921_v4  ;;  %v18_v6 = vld [vmem:[%s1174_s1] sm:$0xff] }
   0x4   :  { %799 = vmatpush3.bf16.msra.mxu0 %v798_v3 }
   0x5   :  { %732 = vmatprep.subr.mxu0 %v921_v4 }
   0x8   :  { %733 = vmatpush3.msk.msra.mxu0 %vm106_vm1, %v41_v5 }
   0x9   :  { %735 = vmatmul.mubr.msk.f32.vlgmr.msra.gmra.mrb[0].mxu0 %vm42_vm2, %v18_v6 }
   0xa   :  { %9 = vsyncpa [#allocation3], 0  ;;  %737 = vmatprep.mubr.msk.f32.mxu0 %vm920_vm0, %v921_v4  ;;  %v19_v7 = vld [vmem:[%s1174_s1 + $0x8] sm:$0xff]  ;;  %v20_v8 = vld [vmem:[%s1174_s1 + $0x10] sm:$0xff]  ;;  %vm418_vm3 = vcmask 269312   ;;  %s922_s15 = smov 32  }
   0xb   :  { %v21_v9 = vld [vmem:[%s1174_s1 + $0x18] sm:$0xff]  ;;  %v22_v10 = vld [vmem:[%s1174_s1 + $0x20] sm:$0xff]  ;;  %v23_v11 = vld [vmem:[%s1174_s1 + $0x28] sm:$0xff]  ;;  %s923_s16 = smov 96   ;;  %s924_s17 = smov 64  }
   0xc   :  { %v24_v12 = vld [vmem:[%s1174_s1 + $0x30] sm:$0xff]  ;;  %v25_v13 = vld [vmem:[%s1174_s1 + $0x38] sm:$0xff]  ;;  %v26_v14 = vld [vmem:[%s1174_s1 + $0x40] sm:$0xff] }
   0xd   :  { %738 = vmatmul.mubr.msk.f32.gmra.mrb[2].mxu0 %vm42_vm2, %v19_v7  ;;  %v27_v15 = vld [vmem:[%s1174_s1 + $0x48] sm:$0xff]  ;;  %v28_v16 = vld [vmem:[%s1174_s1 + $0x50] sm:$0xff]  ;;  %v29_v17 = vld [vmem:[%s1174_s1 + $0x58] sm:$0xff] }
   0xe   :  { %740 = vmatprep.mubr.msk.f32.mxu0 %vm920_vm0, %v921_v4  ;;  %v30_v18 = vld [vmem:[%s1174_s1 + $0x60] sm:$0xff]  ;;  %v31_v19 = vld [vmem:[%s1174_s1 + $0x68] sm:$0xff]  ;;  %v32_v20 = vld [vmem:[%s1174_s1 + $0x70] sm:$0xff] }
   0xf   :  { %v33_v21 = vld [vmem:[%s1174_s1 + $0x78] sm:$0xff]  ;;  %v34_v22 = vld [vmem:[%s1174_s1 + $0x80] sm:$0xff]  ;;  %v35_v23 = vld [vmem:[%s1174_s1 + $0x88] sm:$0xff] }
  0x10   :  { %v36_v24 = vld [vmem:[%s1174_s1 + $0x90] sm:$0xff]  ;;  %v37_v25 = vld [vmem:[%s1174_s1 + $0x98] sm:$0xff]  ;;  %v38_v26 = vld [vmem:[%s1174_s1 + $0xa0] sm:$0x1] }
  0x11   :  { %741 = vmatmul.mubr.msk.f32.gmra.mrb[4].mxu0 %vm42_vm2, %v20_v8  ;;  %v407_v27 = vld [vmem:[%s1175_s2 + $0x8] sm:$0xff] }
  0x12   :  { %743 = vmatprep.mubr.msk.f32.mxu0 %vm920_vm0, %v921_v4  ;;  %691 = vmatprep.mubr.msk.f32.mxu1 %vm418_vm3, %v407_v27 }
  0x15   :  { %744 = vmatmul.mubr.msk.f32.gmra.mrb[6].mxu0 %vm42_vm2, %v21_v9 }
  0x16   :  { %746 = vmatprep.mubr.msk.f32.mxu0 %vm920_vm0, %v921_v4 }
  0x19   :  { %747 = vmatmul.mubr.msk.f32.gmra.mrb[8].mxu0 %vm42_vm2, %v22_v10 }
  0x1a   :  { %749 = vmatprep.mubr.msk.f32.mxu0 %vm920_vm0, %v921_v4 }
  0x1d   :  { %750 = vmatmul.mubr.msk.f32.gmra.mrb[10].mxu0 %vm42_vm2, %v23_v11 }
  0x1e   :  { %752 = vmatprep.mubr.msk.f32.mxu0 %vm920_vm0, %v921_v4 }
  0x21   :  { %753 = vmatmul.mubr.msk.f32.gmra.mrb[12].mxu0 %vm42_vm2, %v24_v12 }
  0x22   :  { %755 = vmatprep.mubr.msk.f32.mxu0 %vm920_vm0, %v921_v4 }
  0x25   :  { %756 = vmatmul.mubr.msk.f32.gmra.mrb[14].mxu0 %vm42_vm2, %v25_v13 }
  0x26   :  { %758 = vmatprep.mubr.msk.f32.mxu0 %vm920_vm0, %v921_v4 }
  0x29   :  { %759 = vmatmul.mubr.msk.f32.gmra.mrb[16].mxu0 %vm42_vm2, %v26_v14 }
  0x2a   :  { %761 = vmatprep.mubr.msk.f32.mxu0 %vm920_vm0, %v921_v4 }
  0x2d   :  { %762 = vmatmul.mubr.msk.f32.gmra.mrb[18].mxu0 %vm42_vm2, %v27_v15 }
  0x2e   :  { %764 = vmatprep.mubr.msk.f32.mxu0 %vm920_vm0, %v921_v4 }
  0x31   :  { %765 = vmatmul.mubr.msk.f32.gmra.mrb[20].mxu0 %vm42_vm2, %v28_v16 }
  0x32   :  { %767 = vmatprep.mubr.msk.f32.mxu0 %vm920_vm0, %v921_v4 }
  0x35   :  { %768 = vmatmul.mubr.msk.f32.gmra.mrb[22].mxu0 %vm42_vm2, %v29_v17 }
  0x36   :  { %770 = vmatprep.mubr.msk.f32.mxu0 %vm920_vm0, %v921_v4 }
  0x39   :  { %771 = vmatmul.mubr.msk.f32.gmra.mrb[24].mxu0 %vm42_vm2, %v30_v18 }
  0x3a   :  { %773 = vmatprep.mubr.msk.f32.mxu0 %vm920_vm0, %v921_v4 }
  0x3d   :  { %774 = vmatmul.mubr.msk.f32.gmra.mrb[26].mxu0 %vm42_vm2, %v31_v19 }
  0x3e   :  { %776 = vmatprep.mubr.msk.f32.mxu0 %vm920_vm0, %v921_v4 }
  0x41   :  { %777 = vmatmul.mubr.msk.f32.gmra.mrb[28].mxu0 %vm42_vm2, %v32_v20 }
  0x42   :  { %779 = vmatprep.mubr.msk.f32.mxu0 %vm920_vm0, %v921_v4 }
  0x45   :  { %780 = vmatmul.mubr.msk.f32.gmra.mrb[30].mxu0 %vm42_vm2, %v33_v21 }
  0x46   :  { %782 = vmatprep.mubr.msk.f32.mxu0 %vm920_vm0, %v921_v4 }
  0x49   :  { %783 = vmatmul.mubr.msk.f32.gmra.mrb[32].mxu0 %vm42_vm2, %v34_v22 }
  0x4a   :  { %785 = vmatprep.mubr.msk.f32.mxu0 %vm920_vm0, %v921_v4 }
  0x4d   :  { %786 = vmatmul.mubr.msk.f32.gmra.mrb[34].mxu0 %vm42_vm2, %v35_v23 }
  0x4e   :  { %788 = vmatprep.mubr.msk.f32.mxu0 %vm920_vm0, %v921_v4 }
  0x51   :  { %789 = vmatmul.mubr.msk.f32.gmra.mrb[36].mxu0 %vm42_vm2, %v36_v24 }
  0x52   :  { %791 = vmatprep.mubr.msk.f32.mxu0 %vm920_vm0, %v921_v4 }
  0x55   :  { %792 = vmatmul.mubr.msk.f32.gmra.mrb[38].mxu0 %vm42_vm2, %v37_v25 }
  0x56   :  { %794 = vmatprep.mubr.msk.f32.mxu0 %vm920_vm0, %v921_v4 }
  0x59   :  { %795 = vmatmul.mubr.msk.f32.gmra.mrb[40].mxu0 %vm42_vm2, %v38_v26 }
  0xdc   :  { %v176_v28 = vpop.f32.mrb[0].mxu0 }
  0xdd   :  { %v301_v29 = vmin.f32 %v176_v28, 0.0  ;;  %v736_v30 = vpop.f32.mrb[1].mxu0  ;;  %vm280_vm4 = vcmp.gt.f32.partialorder %v176_v28, 0.0 }
  0xdf   :  { %v322_v31 = vmul.f32 1.442695, %v301_v29 }
  0xe0   :  { %v181_v32 = vpop.f32.mrb[2].mxu0 }
  0xe1   :  { %837 = vpow2.f32 %v322_v31  ;;  %v302_v33 = vmin.f32 %v181_v32, 0.0  ;;  %v739_v34 = vpop.f32.mrb[3].mxu0  ;;  %vm281_vm5 = vcmp.gt.f32.partialorder %v181_v32, 0.0 }
  0xe3   :  { %v324_v35 = vmul.f32 1.442695, %v302_v33 }
  0xe4   :  { %v186_v36 = vpop.f32.mrb[4].mxu0 }
  0xe5   :  { %839 = vpow2.f32 %v324_v35  ;;  %v303_v37 = vmin.f32 %v186_v36, 0.0  ;;  %v742_v38 = vpop.f32.mrb[5].mxu0  ;;  %vm282_vm6 = vcmp.gt.f32.partialorder %v186_v36, 0.0 }
  0xe7   :  { %v326_v39 = vmul.f32 1.442695, %v303_v37 }
  0xe8   :  { %v191_v40 = vpop.f32.mrb[6].mxu0 }
  0xe9   :  { %841 = vpow2.f32 %v326_v39  ;;  %v304_v41 = vmin.f32 %v191_v40, 0.0  ;;  %v745_v42 = vpop.f32.mrb[7].mxu0  ;;  %vm283_vm7 = vcmp.gt.f32.partialorder %v191_v40, 0.0 }
  0xeb   :  { %v838_v43 = vpop.eup %837  ;;  %v328_v44 = vmul.f32 1.442695, %v304_v41 }
  0xec   :  { %v196_v45 = vpop.f32.mrb[8].mxu0  ;;  %v669_v48 = vadd.f32 -1.0, %v838_v43 }
  0xed   :  { %843 = vpow2.f32 %v328_v44  ;;  %v305_v46 = vmin.f32 %v196_v45, 0.0  ;;  %v748_v47 = vpop.f32.mrb[9].mxu0  ;;  %vm284_vm8 = vcmp.gt.f32.partialorder %v196_v45, 0.0 }
  0xee   :  { %v385_v55 = vsel %vm280_vm4, %v176_v28, %v669_v48 }
  0xef   :  { %v840_v49 = vpop.eup %839  ;;  %v330_v50 = vmul.f32 1.442695, %v305_v46 }
  0xf0   :  { %v201_v51 = vpop.f32.mrb[10].mxu0  ;;  %v670_v52 = vadd.f32 -1.0, %v840_v49 }
  0xf1   :  { %845 = vpow2.f32 %v330_v50  ;;  %v306_v53 = vmin.f32 %v201_v51, 0.0  ;;  %v751_v54 = vpop.f32.mrb[11].mxu0  ;;  %vm285_vm9 = vcmp.gt.f32.partialorder %v201_v51, 0.0 }
  0xf2   :  { %v386_v56 = vsel %vm281_vm5, %v181_v32, %v670_v52 }
  0xf3   :  { %v842_v57 = vpop.eup %841  ;;  %v332_v58 = vmul.f32 1.442695, %v306_v53  ;;  %v801_v59 = vpack.c.bf16 %v386_v56, %v385_v55 }
  0xf4   :  { %v206_v60 = vpop.f32.mrb[12].mxu0  ;;  %v671_v63 = vadd.f32 -1.0, %v842_v57 }
  0xf5   :  { %847 = vpow2.f32 %v332_v58  ;;  %v307_v61 = vmin.f32 %v206_v60, 0.0  ;;  %v754_v62 = vpop.f32.mrb[13].mxu0  ;;  %802 = vmatpush1.bf16.msra.mxu1 %v801_v59  ;;  %vm286_vm10 = vcmp.gt.f32.partialorder %v206_v60, 0.0 }
  0xf6   :  { %803 = vmatprep.subr.bf16.mxu1 %v919_v2  ;;  %v387_v8 = vsel %vm282_vm6, %v186_v36, %v671_v63 }
  0xf7   :  { %v844_v0 = vpop.eup %843  ;;  %v334_v1 = vmul.f32 1.442695, %v307_v61 }
  0xf8   :  { %v672_v3 = vadd.f32 -1.0, %v844_v0  ;;  %v211_v5 = vpop.f32.mrb[14].mxu0 }
  0xf9   :  { %849 = vpow2.f32 %v334_v1  ;;  %v308_v6 = vmin.f32 %v211_v5, 0.0  ;;  %v757_v7 = vpop.f32.mrb[15].mxu0  ;;  %vm287_vm11 = vcmp.gt.f32.partialorder %v211_v5, 0.0 }
  0xfa   :  { %v388_v9 = vsel %vm283_vm7, %v191_v40, %v672_v3 }
  0xfb   :  { %v846_v10 = vpop.eup %845  ;;  %v336_v11 = vmul.f32 1.442695, %v308_v6  ;;  %v804_v12 = vpack.c.bf16 %v388_v9, %v387_v8 }
  0xfc   :  { %v216_v13 = vpop.f32.mrb[16].mxu0  ;;  %v673_v16 = vadd.f32 -1.0, %v846_v10 }
  0xfd   :  { %851 = vpow2.f32 %v336_v11  ;;  %v309_v14 = vmin.f32 %v216_v13, 0.0  ;;  %v760_v15 = vpop.f32.mrb[17].mxu0  ;;  %805 = vmatpush1.bf16.msra.mxu1 %v804_v12  ;;  %vm288_vm12 = vcmp.gt.f32.partialorder %v216_v13, 0.0 }
  0xfe   :  { %806 = vmatprep.subr.bf16.mxu1 %v919_v2  ;;  %v389_v23 = vsel %vm284_vm8, %v196_v45, %v673_v16 }
  0xff   :  { %v848_v17 = vpop.eup %847  ;;  %v338_v18 = vmul.f32 1.442695, %v309_v14 }
 0x100   :  { %v674_v19 = vadd.f32 -1.0, %v848_v17  ;;  %v221_v20 = vpop.f32.mrb[18].mxu0 }
 0x101   :  { %853 = vpow2.f32 %v338_v18  ;;  %v310_v21 = vmin.f32 %v221_v20, 0.0  ;;  %v763_v22 = vpop.f32.mrb[19].mxu0  ;;  %vm289_vm13 = vcmp.gt.f32.partialorder %v221_v20, 0.0 }
 0x102   :  { %v390_v24 = vsel %vm285_vm9, %v201_v51, %v674_v19  ;;  %vm437_vm9 = vcmask 1040384  }
 0x103   :  { %v850_v25 = vpop.eup %849  ;;  %v340_v26 = vmul.f32 1.442695, %v310_v21  ;;  %v807_v27 = vpack.c.bf16 %v390_v24, %v389_v23 }
 0x104   :  { %v226_v28 = vpop.f32.mrb[20].mxu0  ;;  %v675_v31 = vadd.f32 -1.0, %v850_v25 }
 0x105   :  { %855 = vpow2.f32 %v340_v26  ;;  %v311_v29 = vmin.f32 %v226_v28, 0.0  ;;  %v766_v30 = vpop.f32.mrb[21].mxu0  ;;  %808 = vmatpush1.bf16.msra.mxu1 %v807_v27  ;;  %vm290_vm14 = vcmp.gt.f32.partialorder %v226_v28, 0.0 }
 0x106   :  { %809 = vmatprep.subr.bf16.mxu1 %v919_v2  ;;  %v391_v38 = vsel %vm286_vm10, %v206_v60, %v675_v31 }
 0x107   :  { %v852_v32 = vpop.eup %851  ;;  %v342_v33 = vmul.f32 1.442695, %v311_v29 }
 0x108   :  { %v676_v34 = vadd.f32 -1.0, %v852_v32  ;;  %v231_v35 = vpop.f32.mrb[22].mxu0 }
 0x109   :  { %857 = vpow2.f32 %v342_v33  ;;  %v312_v36 = vmin.f32 %v231_v35, 0.0  ;;  %v769_v37 = vpop.f32.mrb[23].mxu0  ;;  %vm291_vm15 = vcmp.gt.f32.partialorder %v231_v35, 0.0 }
 0x10a   :  { %v392_v39 = vsel %vm287_vm11, %v211_v5, %v676_v34 }
 0x10b   :  { %v854_v40 = vpop.eup %853  ;;  %v344_v41 = vmul.f32 1.442695, %v312_v36  ;;  %v810_v42 = vpack.c.bf16 %v392_v39, %v391_v38 }
 0x10c   :  { %v236_v43 = vpop.f32.mrb[24].mxu0  ;;  %v677_v46 = vadd.f32 -1.0, %v854_v40 }
 0x10d   :  { %859 = vpow2.f32 %v344_v41  ;;  %v313_v44 = vmin.f32 %v236_v43, 0.0  ;;  %v772_v45 = vpop.f32.mrb[25].mxu0  ;;  %811 = vmatpush1.bf16.msra.mxu1 %v810_v42  ;;  %vm292_vm0 = vcmp.gt.f32.partialorder %v236_v43, 0.0 }
 0x10e   :  { %812 = vmatprep.subr.bf16.mxu1 %v919_v2  ;;  %v393_v53 = vsel %vm288_vm12, %v216_v13, %v677_v46 }
 0x10f   :  { %v856_v47 = vpop.eup %855  ;;  %v346_v48 = vmul.f32 1.442695, %v313_v44 }
 0x110   :  { %v678_v49 = vadd.f32 -1.0, %v856_v47  ;;  %v241_v50 = vpop.f32.mrb[26].mxu0 }
 0x111   :  { %861 = vpow2.f32 %v346_v48  ;;  %v314_v51 = vmin.f32 %v241_v50, 0.0  ;;  %v775_v52 = vpop.f32.mrb[27].mxu0  ;;  %vm293_vm1 = vcmp.gt.f32.partialorder %v241_v50, 0.0 }
 0x112   :  { %v394_v54 = vsel %vm289_vm13, %v221_v20, %v678_v49 }
 0x113   :  { %v858_v55 = vpop.eup %857  ;;  %v348_v56 = vmul.f32 1.442695, %v314_v51  ;;  %v813_v57 = vpack.c.bf16 %v394_v54, %v393_v53 }
 0x114   :  { %v246_v58 = vpop.f32.mrb[28].mxu0  ;;  %v679_v61 = vadd.f32 -1.0, %v858_v55 }
 0x115   :  { %863 = vpow2.f32 %v348_v56  ;;  %v315_v59 = vmin.f32 %v246_v58, 0.0  ;;  %v778_v60 = vpop.f32.mrb[29].mxu0  ;;  %814 = vmatpush1.bf16.msra.mxu1 %v813_v57  ;;  %vm294_vm2 = vcmp.gt.f32.partialorder %v246_v58, 0.0 }
 0x116   :  { %815 = vmatprep.subr.bf16.mxu1 %v919_v2  ;;  %v395_v6 = vsel %vm290_vm14, %v226_v28, %v679_v61  ;;  %v406_v60 = vld [vmem:[%s1175_s2] sm:$0xff] }
 0x117   :  { %v860_v62 = vpop.eup %859  ;;  %v350_v63 = vmul.f32 1.442695, %v315_v59 }
 0x118   :  { %v680_v0 = vadd.f32 -1.0, %v860_v62  ;;  %v251_v1 = vpop.f32.mrb[30].mxu0  ;;  %v411_v62 = vld [vmem:[%s1175_s2 + $0x28] sm:$0xff] }
 0x119   :  { %865 = vpow2.f32 %v350_v63  ;;  %v316_v3 = vmin.f32 %v251_v1, 0.0  ;;  %v781_v5 = vpop.f32.mrb[31].mxu0  ;;  %vm295_vm4 = vcmp.gt.f32.partialorder %v251_v1, 0.0  ;;  %v410_v63 = vld [vmem:[%s1175_s2 + $0x20] sm:$0xff] }
 0x11a   :  { %v396_v7 = vsel %vm291_vm15, %v231_v35, %v680_v0  ;;  %v413_v0 = vld [vmem:[%s1175_s2 + $0x38] sm:$0xff]  ;;  %v414_v5 = vld [vmem:[%s1175_s2 + $0x40] sm:$0xff] }
 0x11b   :  { %v862_v8 = vpop.eup %861  ;;  %v352_v9 = vmul.f32 1.442695, %v316_v3  ;;  %v816_v10 = vpack.c.bf16 %v396_v7, %v395_v6  ;;  %v415_v3 = vld [vmem:[%s1175_s2 + $0x48] sm:$0xff]  ;;  %v417_v6 = vld [vmem:[%s1175_s2 + $0x58] sm:$0x1] }
 0x11c   :  { %v256_v11 = vpop.f32.mrb[32].mxu0  ;;  %v681_v14 = vadd.f32 -1.0, %v862_v8  ;;  %v416_v7 = vld [vmem:[%s1175_s2 + $0x50] sm:$0x1] }
 0x11d   :  { %867 = vpow2.f32 %v352_v9  ;;  %v317_v12 = vmin.f32 %v256_v11, 0.0  ;;  %v784_v13 = vpop.f32.mrb[33].mxu0  ;;  %817 = vmatpush1.bf16.msra.mxu1 %v816_v10  ;;  %vm296_vm5 = vcmp.gt.f32.partialorder %v256_v11, 0.0 }
 0x11e   :  { %818 = vmatprep.subr.bf16.mxu1 %v919_v2  ;;  %v397_v21 = vsel %vm292_vm0, %v236_v43, %v681_v14  ;;  %vm596_vm0 = vcmask 261120  }
 0x11f   :  { %v864_v15 = vpop.eup %863  ;;  %v354_v16 = vmul.f32 1.442695, %v317_v12 }
 0x120   :  { %v682_v17 = vadd.f32 -1.0, %v864_v15  ;;  %v261_v18 = vpop.f32.mrb[34].mxu0 }
 0x121   :  { %869 = vpow2.f32 %v354_v16  ;;  %v318_v19 = vmin.f32 %v261_v18, 0.0  ;;  %v787_v20 = vpop.f32.mrb[35].mxu0  ;;  %vm297_vm6 = vcmp.gt.f32.partialorder %v261_v18, 0.0 }
 0x122   :  { %v398_v22 = vsel %vm293_vm1, %v241_v50, %v682_v17  ;;  %vm619_vm1 = vcmask 7168  }
 0x123   :  { %v866_v23 = vpop.eup %865  ;;  %v356_v24 = vmul.f32 1.442695, %v318_v19  ;;  %v819_v25 = vpack.c.bf16 %v398_v22, %v397_v21 }
 0x124   :  { %v266_v26 = vpop.f32.mrb[36].mxu0  ;;  %v683_v29 = vadd.f32 -1.0, %v866_v23 }
 0x125   :  { %871 = vpow2.f32 %v356_v24  ;;  %v319_v27 = vmin.f32 %v266_v26, 0.0  ;;  %v790_v28 = vpop.f32.mrb[37].mxu0  ;;  %820 = vmatpush1.bf16.msra.mxu1 %v819_v25  ;;  %vm298_vm7 = vcmp.gt.f32.partialorder %v266_v26, 0.0 }
 0x126   :  { %821 = vmatprep.subr.bf16.mxu1 %v919_v2  ;;  %v399_v36 = vsel %vm294_vm2, %v246_v58, %v683_v29  ;;  %vm621_vm2 = vcmask 15360  }
 0x127   :  { %v868_v30 = vpop.eup %867  ;;  %v358_v31 = vmul.f32 1.442695, %v319_v27 }
 0x128   :  { %v684_v32 = vadd.f32 -1.0, %v868_v30  ;;  %v271_v33 = vpop.f32.mrb[38].mxu0 }
 0x129   :  { %873 = vpow2.f32 %v358_v31  ;;  %v320_v34 = vmin.f32 %v271_v33, 0.0  ;;  %v793_v35 = vpop.f32.mrb[39].mxu0  ;;  %vm299_vm8 = vcmp.gt.f32.partialorder %v271_v33, 0.0 }
 0x12a   :  { %v400_v37 = vsel %vm295_vm4, %v251_v1, %v684_v32  ;;  %v412_v1 = vld [vmem:[%s1175_s2 + $0x30] sm:$0xff]  ;;  %v572_v32 = vld [vmem:[%s1176_s3] sm:$0xff]  ;;  %vm623_vm4 = vcmask 23552  }
 0x12b   :  { %v870_v38 = vpop.eup %869  ;;  %v360_v39 = vmul.f32 1.442695, %v320_v34  ;;  %v822_v40 = vpack.c.bf16 %v400_v37, %v399_v36  ;;  %v573_v34 = vld [vmem:[%s1176_s3 + $0x8] sm:$0xff] }
 0x12c   :  { %v276_v41 = vpop.f32.mrb[40].mxu0  ;;  %v685_v44 = vadd.f32 -1.0, %v870_v38 }
 0x12d   :  { %875 = vpow2.f32 %v360_v39  ;;  %v321_v42 = vmin.f32 %v276_v41, 0.0  ;;  %823 = vmatpush1.bf16.msra.mxu1 %v822_v40  ;;  %v796_v43 = vpop.f32.mrb[41].mxu0  ;;  %vm300_vm10 = vcmp.gt.f32.partialorder %v276_v41, 0.0 }
 0x12e   :  { %824 = vmatprep.subr.bf16.mxu1 %v919_v2  ;;  %v401_v48 = vsel %vm296_vm5, %v256_v11, %v685_v44  ;;  %v574_v44 = vld [vmem:[%s1176_s3 + $0x10] sm:$0xff]  ;;  %vm631_vm5 = vcmask 24576  }
 0x12f   :  { %v872_v45 = vpop.eup %871  ;;  %v362_v46 = vmul.f32 1.442695, %v321_v42 }
 0x130   :  { %v686_v47 = vadd.f32 -1.0, %v872_v45 }
 0x131   :  { %877 = vpow2.f32 %v362_v46 }
 0x132   :  { %v402_v49 = vsel %vm297_vm6, %v261_v18, %v686_v47 }
 0x133   :  { %v874_v50 = vpop.eup %873  ;;  %v825_v51 = vpack.c.bf16 %v402_v49, %v401_v48 }
 0x134   :  { %v687_v52 = vadd.f32 -1.0, %v874_v50  ;;  %v575_v50 = vld [vmem:[%s1176_s3 + $0x18] sm:$0xff] }
 0x135   :  { %826 = vmatpush1.bf16.msra.mxu1 %v825_v51 }
 0x136   :  { %827 = vmatprep.subr.bf16.mxu1 %v919_v2  ;;  %v403_v55 = vsel %vm298_vm7, %v266_v26, %v687_v52  ;;  %v409_v2 = vld [vmem:[%s1175_s2 + $0x18] sm:$0xff] }
 0x137   :  { %v876_v53 = vpop.eup %875 }
 0x138   :  { %v688_v54 = vadd.f32 -1.0, %v876_v53 }
 0x13a   :  { %v404_v56 = vsel %vm299_vm8, %v271_v33, %v688_v54 }
 0x13b   :  { %v878_v57 = vpop.eup %877  ;;  %v828_v58 = vpack.c.bf16 %v404_v56, %v403_v55  ;;  %v576_v56 = vld [vmem:[%s1176_s3 + $0x20] sm:$0xff] }
 0x13c   :  { %v689_v59 = vadd.f32 -1.0, %v878_v57 }
 0x13d   :  { %829 = vmatpush1.bf16.msra.mxu1 %v828_v58 }
 0x13e   :  { %481 = vmatprep.subr.mxu1 %v921_v4  ;;  %v405_v61 = vsel %vm300_vm10, %v276_v41, %v689_v59  ;;  %v408_v4 = vld [vmem:[%s1175_s2 + $0x10] sm:$0xff] }
 0x141   :  { %690 = vmatpush1.msk.msra.mxu1 %vm437_vm9, %v405_v61 }
 0x142   :  { %506 = vmatmul.mubr.f32.vlgmr.msra.gmra.mrb[0].mxu1 %v406_v60 }
 0x143   :  { %692 = vmatprep.mubr.msk.f32.mxu1 %vm418_vm3, %v409_v2  ;;  %v577_v2 = vld [vmem:[%s1176_s3 + $0x28] sm:$0x1]  ;;  %s925_s3 = smov [#allocation2]  }
 0x144   :  { %s639_s18 = sshll.u32 %s925_s3, 4  ;;  %s640_s18 = int_to_ptr.vmem [resolvable:$true] %s639_s18 }
 0x145   :  { %s895_s19 = scalar_lea.vmem %s640_s18, 16  ;;  %s899_s20 = scalar_lea.vmem %s640_s18, 32 }
 0x146   :  { %511 = vmatmul.mubr.f32.gmra.mrb[2].mxu1 %v408_v4  ;;  %p896_p0 = scmp.ne.s32.totalorder %s640_s18, %s895_s19  ;;  %p900_p1 = scmp.lt.s32.totalorder %s640_s18, %s640_s18 }
 0x147   :  { %693 = vmatprep.mubr.msk.f32.mxu1 %vm418_vm3, %v411_v62  ;;  %p901_p2 = scmp.lt.s32.totalorder %s899_s20, %s895_s19 }
 0x149   :  { %p902_p3 = por %p901_p2, %p900_p1 }
 0x14a   :  { %516 = vmatmul.mubr.f32.gmra.mrb[4].mxu1 %v410_v63 }
 0x14b   :  { %694 = vmatprep.mubr.msk.f32.mxu1 %vm418_vm3, %v413_v0  ;;  %p903_p4 = pnand %p902_p3, %p896_p0 }
 0x14e   :  { %521 = vmatmul.mubr.f32.gmra.mrb[6].mxu1 %v412_v1 }
 0x14f   :  { %695 = vmatprep.mubr.msk.f32.mxu1 %vm418_vm3, %v415_v3 }
 0x152   :  { %526 = vmatmul.mubr.f32.gmra.mrb[8].mxu1 %v414_v5 }
 0x153   :  { %696 = vmatprep.mubr.msk.f32.mxu1 %vm418_vm3, %v417_v6 }
 0x156   :  { %531 = vmatmul.mubr.f32.gmra.mrb[10].mxu1 %v416_v7 }
 0x215   :  { %v507_v8 = vpop.f32.mrb[0].mxu1 }
 0x216   :  { %v542_v9 = vmin.f32 %v507_v8, 0.0  ;;  %v509_v10 = vpop.f32.mrb[1].mxu1  ;;  %vm536_vm3 = vcmp.gt.f32.partialorder %v507_v8, 0.0 }
 0x218   :  { %v548_v11 = vmul.f32 1.442695, %v542_v9 }
 0x219   :  { %v512_v12 = vpop.f32.mrb[2].mxu1 }
 0x21a   :  { %879 = vpow2.f32 %v548_v11  ;;  %v543_v13 = vmin.f32 %v512_v12, 0.0  ;;  %v514_v14 = vpop.f32.mrb[3].mxu1  ;;  %vm537_vm11 = vcmp.gt.f32.partialorder %v512_v12, 0.0 }
 0x21c   :  { %v550_v15 = vmul.f32 1.442695, %v543_v13 }
 0x21d   :  { %v517_v16 = vpop.f32.mrb[4].mxu1 }
 0x21e   :  { %881 = vpow2.f32 %v550_v15  ;;  %v544_v17 = vmin.f32 %v517_v16, 0.0  ;;  %v519_v18 = vpop.f32.mrb[5].mxu1  ;;  %vm538_vm12 = vcmp.gt.f32.partialorder %v517_v16, 0.0 }
 0x220   :  { %v552_v19 = vmul.f32 1.442695, %v544_v17 }
 0x221   :  { %v522_v20 = vpop.f32.mrb[6].mxu1 }
 0x222   :  { %883 = vpow2.f32 %v552_v19  ;;  %v545_v21 = vmin.f32 %v522_v20, 0.0  ;;  %v524_v22 = vpop.f32.mrb[7].mxu1  ;;  %vm539_vm13 = vcmp.gt.f32.partialorder %v522_v20, 0.0 }
 0x224   :  { %v880_v23 = vpop.eup %879  ;;  %v554_v24 = vmul.f32 1.442695, %v545_v21 }
 0x225   :  { %v697_v25 = vadd.f32 -1.0, %v880_v23  ;;  %v527_v26 = vpop.f32.mrb[8].mxu1 }
 0x226   :  { %885 = vpow2.f32 %v554_v24  ;;  %v546_v27 = vmin.f32 %v527_v26, 0.0  ;;  %v529_v28 = vpop.f32.mrb[9].mxu1  ;;  %vm540_vm14 = vcmp.gt.f32.partialorder %v527_v26, 0.0 }
 0x227   :  { %v566_v31 = vsel %vm536_vm3, %v507_v8, %v697_v25 }
 0x228   :  { %v882_v29 = vpop.eup %881  ;;  %v556_v30 = vmul.f32 1.442695, %v546_v27  ;;  %v578_v40 = vmul.f32 %v572_v32, %v566_v31 }
 0x229   :  { %v698_v33 = vadd.f32 -1.0, %v882_v29  ;;  %v532_v35 = vpop.f32.mrb[10].mxu1 }
 0x22a   :  { %887 = vpow2.f32 %v556_v30  ;;  %v547_v36 = vmin.f32 %v532_v35, 0.0  ;;  %v534_v37 = vpop.f32.mrb[11].mxu1  ;;  %vm541_vm15 = vcmp.gt.f32.partialorder %v532_v35, 0.0 }
 0x22b   :  { %v567_v38 = vsel %vm537_vm11, %v512_v12, %v698_v33 }
 0x22c   :  { %v884_v39 = vpop.eup %883  ;;  %v579_v41 = vmul.f32 %v573_v34, %v567_v38  ;;  %v558_v42 = vmul.f32 1.442695, %v547_v36 }
 0x22d   :  { %v699_v43 = vadd.f32 -1.0, %v884_v39 }
 0x22e   :  { %v584_v45 = vadd.f32 %v579_v41, %v578_v40  ;;  %889 = vpow2.f32 %v558_v42 }
 0x22f   :  { %v568_v46 = vsel %vm538_vm12, %v517_v16, %v699_v43 }
 0x230   :  { %v886_v47 = vpop.eup %885  ;;  %v580_v48 = vmul.f32 %v574_v44, %v568_v46 }
 0x231   :  { %v700_v49 = vadd.f32 -1.0, %v886_v47 }
 0x232   :  { %v585_v51 = vadd.f32 %v584_v45, %v580_v48 }
 0x233   :  { %v569_v52 = vsel %vm539_vm13, %v522_v20, %v700_v49 }
 0x234   :  { %v888_v53 = vpop.eup %887  ;;  %v581_v54 = vmul.f32 %v575_v50, %v569_v52 }
 0x235   :  { %v701_v55 = vadd.f32 -1.0, %v888_v53 }
 0x236   :  { %v586_v57 = vadd.f32 %v585_v51, %v581_v54 }
 0x237   :  { %v570_v58 = vsel %vm540_vm14, %v527_v26, %v701_v55 }
 0x238   :  { %v890_v59 = vpop.eup %889  ;;  %v582_v60 = vmul.f32 %v576_v56, %v570_v58 }
 0x239   :  { %v702_v61 = vadd.f32 -1.0, %v890_v59 }
 0x23a   :  { %v587_v4 = vadd.f32 %v586_v57, %v582_v60 }
 0x23b   :  { %v571_v62 = vsel %vm541_vm15, %v532_v35, %v702_v61 }
 0x23c   :  { %v583_v63 = vmul.f32 %v577_v2, %v571_v62 }
 0x23e   :  { %v588_v0 = vsel %vm437_vm9, %v583_v63, 0.0 }
 0x23f   :  { %v589_v1 = vadd.f32 %v588_v0, %v587_v4 }
 0x241   :  { %v590_v3 = vrot.slane %v589_v1, 4 }
 0x243   :  { %v591_v5 = vadd.f32 %v590_v3, %v589_v1 }
 0x245   :  { %v592_v6 = vrot.slane %v591_v5, 2 }
 0x247   :  { %v593_v7 = vadd.f32 %v592_v6, %v591_v5 }
 0x249   :  { %v594_v8 = vrot.slane %v593_v7, 1 }
 0x24b   :  { %v595_v9 = vadd.f32 %v594_v8, %v593_v7 }
 0x24d   :  { %613 = vrot.lane.b32.xlu1 %v595_v9, %s922_s15  ;;  %601 = vrot.lane.b32.xlu0 %v595_v9, %s923_s16  ;;  %v597_v10 = vsel %vm596_vm0, %v595_v9, 0.0 }
 0x251   :  { %607 = vrot.lane.b32.xlu0 %v595_v9, %s924_s17 }
 0x271   :  { %598 = vadd.xlane.f32.xlu1 %v597_v10 }
 0x2bf   :  { %v614_v11 = vpop.permute.xlu1 %613  ;;  %v602_v12 = vpop.permute.xlu0 %601 }
 0x2c0   :  { %v604_v13 = vsel %vm596_vm0, %v602_v12, 0.0  ;;  %v616_v14 = vsel %vm596_vm0, %v614_v11, 0.0 }
 0x2c1   :  { %605 = vadd.xlane.f32.xlu0 %v604_v13  ;;  %617 = vadd.xlane.f32.xlu1 %v616_v14 }
 0x2c3   :  { %v608_v15 = vpop.permute.xlu0 %607 }
 0x2c4   :  { %v610_v16 = vsel %vm596_vm0, %v608_v15, 0.0 }
 0x2c5   :  { %611 = vadd.xlane.f32.xlu0 %v610_v16 }
 0x2fe   :  { %v599_v18 = vpop.xlane.xlu1 %598 }
 0x34e   :  { %v606_v17 = vpop.xlane.xlu0 %605  ;;  %v618_v21 = vpop.xlane.xlu1 %617 }
 0x34f   :  { %v620_v19 = vsel %vm619_vm1, %v599_v18, %v606_v17 }
 0x352   :  { %v612_v20 = vpop.xlane.xlu0 %611 }
 0x353   :  { %v622_v22 = vsel %vm621_vm2, %v620_v19, %v612_v20 }
 0x354   :  { %v624_v23 = vsel %vm623_vm4, %v622_v22, %v618_v21 }
 0x355   :  { %v703_v24 = vmul.f32 -1.442695, %v624_v23 }
 0x357   :  { %891 = vpow2.f32 %v703_v24 }
 0x361   :  { %v892_v25 = vpop.eup %891 }
 0x362   :  { %v628_v26 = vadd.f32 1.0, %v892_v25 }
 0x364   :  { %893 = vrcp.f32 %v628_v26 }
 0x36e   :  { %v894_v27 = vpop.eup %893 }
 0x36f   :  { %632 = vst.msk [vmem:[#allocation2] sm:$0x1] %vm631_vm5, %v894_v27 }
 0x370   :  { %906 = shalt.err (!%p903_p4)
}
 0x371   :  { %s907_s23 = scalar_lea.hbm %s1177_s4, 16 }
 0x372   :  { %p908_p5 = scmp.ne.s32.totalorder %s1177_s4, %s907_s23  ;;  %p911_p6 = scmp.lt.u32.totalorder %s907_s23, %s1177_s4 }
 0x374   :  { %p913_p7 = pnand %p911_p6, %p908_p5 }
 0x376   :  { %916 = shalt.err (!%p913_p7)
}
 0x377   :  { %642 = dma.vmem_to_hbm [thread:$0]  %s640_s18, 16, %s1177_s4, [#allocation3]  }
 0x378   :  { %917 = dma.done.wait [#allocation3], 16  }
 0x379   :  { %918 = vsyncadd [#allocation3], 4294967280 }
 0x37a   :  { %646 = vsyncpa [#allocation3], 1 }

</bundles_post_ra>
